<compile_context>
chip_gen: v7x
topology: tpu7x:2x2x1
jax: 0.10.0
libtpu: 0.0.40
codegen_flags: <defaults>
</compile_context>

<pallas_src>
import jax
import jax.numpy as jnp
import numpy as np
from jax.experimental import pallas as pl
from jax.experimental.pallas import tpu as pltpu


def _round_up(x, m):
    return ((x + m - 1) // m) * m


def _sine_layer_kernel(x_ref, w_ref, b_ref, o_ref):
    """One (batch, dout) tile: out = sin(x @ W_kn + b).

    omega_0 is already folded into W_kn and b by the wrapper; W_kn is in
    (K, N) orientation so the MXU consumes it directly (no XLU transpose).
    """
    z = jnp.dot(x_ref[...], w_ref[...], preferred_element_type=jnp.float32)
    o_ref[...] = jnp.sin(z + b_ref[...]).astype(o_ref.dtype)


def _vmem_budget_bytes():
    """Generation-aware VMEM budget / scoped limit.

    v5e/v6e have 128 MiB VMEM, v7x has 64 MiB per TensorCore.  Fall back to a
    conservative 32 MiB limit if hardware info is unavailable.
    """
    cap = None
    try:
        cap = int(pltpu.get_tpu_info().vmem_capacity_bytes)
    except Exception:
        cap = None
    if cap is None or cap <= 0:
        limit = 32 * 1024 * 1024
    else:
        limit = min(cap * 3 // 4, 100 * 1024 * 1024)
    budget = limit * 3 // 4          # headroom for compiler scratch etc.
    return budget, limit


def _choose_tiles(batch, din_p, dout, x_bytes, w_bytes, out_bytes, budget_bytes):
    """Jointly pick (tm, tn, dout_p) under a VMEM working-set budget.

    Prefers keeping the whole pre-transposed W resident (tn == padded Dout)
    with the largest batch tile that fits; falls back to tiling Dout when W
    alone is too big.  Batch-padding waste is capped at ~15% when a smaller
    batch tile avoids it.
    """
    tm_cap = _round_up(batch, 8)               # minimal legal padded batch
    tm_candidates = sorted(
        {c for c in (4096, 2048, 1024, 512, 256, 128, 64, 32, 16, 8, tm_cap)
         if c <= tm_cap},
        reverse=True)

    dout_p0 = _round_up(dout, 128)
    tn_candidates = [dout_p0] + [t for t in (4096, 2048, 1024, 512, 256, 128)
                                 if t < dout_p0]

    def pad_waste(tm):
        b_p = _round_up(batch, tm)
        return (b_p - tm_cap) / b_p

    for tn in tn_candidates:
        # W (pre-transposed, possibly bf16) + bias; both default double-buffered.
        fixed = 2 * din_p * tn * w_bytes + 2 * 8 * tn * 4
        fitting = []
        for tm in tm_candidates:
            per_tile = 2 * tm * din_p * x_bytes + 2 * tm * tn * out_bytes
            if fixed + per_tile <= budget_bytes:
                fitting.append(tm)
        if not fitting:
            continue
        good = [tm for tm in fitting if pad_waste(tm) <= 0.15]
        tm = good[0] if good else fitting[-1]
        return tm, tn, _round_up(dout, tn)

    # Even a (din_p, 128) W slab does not fit the budget.
    # TODO(synk): add a K (Din) accumulation grid axis + f32 VMEM scratch for
    # extremely large in_features instead of over-committing VMEM here.
    return 8, 128, _round_up(dout, 128)


def sine_layer(x, weight, bias, omega_0=30.0, use_bf16_inputs=False):
    """SIREN SineLayer forward: sin(omega_0 * (x @ W^T + b)).

    x: (B, Din), weight: (Dout, Din), bias: (Dout,).
    use_bf16_inputs=True casts x/W to bf16 (f32 accumulation) and returns a
    bf16 output — the fast path on v6e/v7x where this layer is HBM-bound.
    """
    B, Din = x.shape
    Dout, Din_w = weight.shape
    assert Din_w == Din, "weight must be (out_features, in_features)"

    compute_dtype = jnp.bfloat16 if use_bf16_inputs else jnp.float32
    elem_bytes = jnp.dtype(compute_dtype).itemsize

    din_p = _round_up(Din, 128)
    budget, vmem_limit = _vmem_budget_bytes()
    tm, tn, dout_p = _choose_tiles(B, din_p, Dout,
                                   x_bytes=elem_bytes, w_bytes=elem_bytes,
                                   out_bytes=elem_bytes,
                                   budget_bytes=budget)
    b_p = _round_up(max(B, tm), tm)

    # One-time prep outside the grid (all effectively free XLA ops):
    #   * fold omega_0 into W and b,
    #   * zero-pad (K-pad zeros are mathematically inert),
    #   * transpose W to (K, N) orientation,
    #   * cast to the compute dtype once (not per grid step).
    w_f = weight.astype(jnp.float32) * float(omega_0)
    b_f = bias.astype(jnp.float32) * float(omega_0)

    w_p = jnp.pad(w_f, ((0, dout_p - Dout), (0, din_p - Din)))
    w_kn = w_p.T.astype(compute_dtype)                      # (din_p, dout_p)
    b_2d = jnp.pad(b_f, (0, dout_p - Dout)).reshape(1, dout_p)  # stays f32

    x_c = x.astype(compute_dtype)
    if (b_p != B) or (din_p != Din):
        x_c = jnp.pad(x_c, ((0, b_p - B), (0, din_p - Din)))

    grid = (b_p // tm, dout_p // tn)
    out_p = pl.pallas_call(
        _sine_layer_kernel,
        out_shape=jax.ShapeDtypeStruct((b_p, dout_p), compute_dtype),
        grid_spec=pltpu.PrefetchScalarGridSpec(
            num_scalar_prefetch=0,
            grid=grid,
            in_specs=[
                # x: one batch tile per step (pipelined HBM<->VMEM).
                pl.BlockSpec((tm, din_p), lambda i, j: (i, 0)),
                # W (K,N): constant over the batch axis; resident when grid[1]==1.
                pl.BlockSpec((din_p, tn), lambda i, j: (0, j)),
                # bias: f32, one lane-dense row per Dout tile.
                pl.BlockSpec((1, tn), lambda i, j: (0, j)),
            ],
            out_specs=pl.BlockSpec((tm, tn), lambda i, j: (i, j)),
        ),
        compiler_params=pltpu.CompilerParams(
            # Independent (batch, dout) tiles -> megacore sharding on v7x.
            dimension_semantics=("parallel", "parallel"),
            vmem_limit_bytes=vmem_limit,
        ),
    )(x_c, w_kn, b_2d)

    # Slice off batch / lane padding.
    return out_p[:B, :Dout]


def init_sine_layer_params(key, in_features, out_features, is_first=False,
                           omega_0=30.0):
    """Deterministic init matching SineLayer.init_weights semantics."""
    kw, kb = jax.random.split(key)
    if is_first:
        bound_w = 1.0 / in_features
    else:
        bound_w = float(np.sqrt(6.0 / in_features) / omega_0)
    weight = jax.random.uniform(kw, (out_features, in_features),
                                dtype=jnp.float32,
                                minval=-bound_w, maxval=bound_w)
    # nn.Linear default bias init (untouched by init_weights):
    bound_b = 1.0 / float(np.sqrt(in_features))
    bias = jax.random.uniform(kb, (out_features,), dtype=jnp.float32,
                              minval=-bound_b, maxval=bound_b)
    return weight, bias


if __name__ == "__main__":
    key = jax.random.PRNGKey(0)
    k_x, k_p = jax.random.split(key)

    # Small, padding-exercising shapes (B not a multiple of 8, Din/Dout < 128).
    B, in_features, out_features = 12, 48, 80
    omega_0 = 30.0
    is_first = True

    x = jax.random.uniform(k_x, (B, in_features), dtype=jnp.float32,
                           minval=-1.0, maxval=1.0)
    weight, bias = init_sine_layer_params(k_p, in_features, out_features,
                                          is_first=is_first, omega_0=omega_0)

    # High-precision reference (f64) for the default f32 path.
    ref = np.sin(omega_0 * (np.asarray(x, np.float64)
                            @ np.asarray(weight, np.float64).T
                            + np.asarray(bias, np.float64)))

    # 1) f32 path: matches the PyTorch module's numerics.
    out_f32 = sine_layer(x, weight, bias, omega_0=omega_0,
                         use_bf16_inputs=False)
    jax.block_until_ready(out_f32)
    np.testing.assert_allclose(np.asarray(out_f32, np.float64), ref,
                               rtol=1e-4, atol=1e-4)

    # 2) bf16 fast path: compare against a reference built from the SAME
    #    bf16-rounded inputs (omega_0 amplifies input rounding inside sin, so
    #    comparing against the f64 reference would need a very loose tolerance).
    out_bf16 = sine_layer(x, weight, bias, omega_0=omega_0,
                          use_bf16_inputs=True)
    jax.block_until_ready(out_bf16)
    x_b = np.asarray(x.astype(jnp.bfloat16), np.float64)
    w_b = np.asarray((weight * omega_0).astype(jnp.bfloat16), np.float64)
    b_b = np.asarray((bias * omega_0).astype(jnp.float32), np.float64)
    ref_bf16 = np.sin(x_b @ w_b.T + b_b)
    np.testing.assert_allclose(np.asarray(out_bf16, np.float64), ref_bf16,
                               rtol=2e-2, atol=2e-2)

    print("KERNEL_OK")
</pallas_src>

<mosaic_0001>
module attributes {stable_mosaic.version = 11 : i64} {
  func.func @_sine_layer_kernel(%arg0: i32, %arg1: i32, %arg2: memref<16x128xf32, #tpu.memory_space<vmem>>, %arg3: memref<128x128xf32, #tpu.memory_space<vmem>>, %arg4: memref<1x128xf32, #tpu.memory_space<vmem>>, %arg5: memref<16x128xf32, #tpu.memory_space<vmem>>) attributes {dimension_semantics = [#tpu.dimension_semantics<parallel>, #tpu.dimension_semantics<parallel>], iteration_bounds = array<i64: 1, 1>, scalar_prefetch = 0 : i64, scratch_operands = 0 : i64, tpu.core_type = #tpu.core_type<tc>, window_params = [{transform_indices = @transform_0, window_bounds = array<i64: 16, 128>}, {transform_indices = @transform_1, window_bounds = array<i64: 128, 128>}, {transform_indices = @transform_2, window_bounds = array<i64: 1, 128>}, {transform_indices = @transform_3, window_bounds = array<i64: 16, 128>}]} {
    %c0 = arith.constant 0 : index
    %c0_0 = arith.constant 0 : index
    %0 = vector.load %arg2[%c0, %c0_0] : memref<16x128xf32, #tpu.memory_space<vmem>>, vector<16x128xf32>
    %c0_1 = arith.constant 0 : index
    %c0_2 = arith.constant 0 : index
    %1 = vector.load %arg3[%c0_1, %c0_2] : memref<128x128xf32, #tpu.memory_space<vmem>>, vector<128x128xf32>
    %cst = arith.constant dense<0.000000e+00> : vector<16x128xf32>
    %2 = tpu.matmul %0, %1, %cst {dimension_numbers = #tpu.dot_dimension_numbers<[1], [0], [0], [1], [0, 0, 1, 1], [], []>} : vector<16x128xf32>, vector<128x128xf32>, vector<16x128xf32> -> vector<16x128xf32>
    %c0_3 = arith.constant 0 : index
    %c0_4 = arith.constant 0 : index
    %3 = vector.load %arg4[%c0_3, %c0_4] : memref<1x128xf32, #tpu.memory_space<vmem>>, vector<1x128xf32>
    %4 = vector.broadcast %3 : vector<1x128xf32> to vector<16x128xf32>
    %5 = arith.addf %2, %4 : vector<16x128xf32>
    %6 = math.sin %5 : vector<16x128xf32>
    %c0_5 = arith.constant 0 : index
    %c0_6 = arith.constant 0 : index
    %7 = vector.load %arg5[%c0_5, %c0_6] : memref<16x128xf32, #tpu.memory_space<vmem>>, vector<16x128xf32>
    tpu.vector_store %arg5[%c0_5, %c0_6], %6 {strides = array<i32>} : memref<16x128xf32, #tpu.memory_space<vmem>>, vector<16x128xf32>,
    return
  }
  func.func @transform_0(%arg0: i32, %arg1: i32) -> (i32, i32) {
    %c0_i32 = arith.constant 0 : i32
    %c0_i32_0 = arith.constant 0 : i32
    return %arg0, %c0_i32 : i32, i32
  }
  func.func @transform_1(%arg0: i32, %arg1: i32) -> (i32, i32) {
    %c0_i32 = arith.constant 0 : i32
    %c0_i32_0 = arith.constant 0 : i32
    return %c0_i32, %arg1 : i32, i32
  }
  func.func @transform_2(%arg0: i32, %arg1: i32) -> (i32, i32) {
    %c0_i32 = arith.constant 0 : i32
    %c0_i32_0 = arith.constant 0 : i32
    return %c0_i32, %arg1 : i32, i32
  }
  func.func @transform_3(%arg0: i32, %arg1: i32) -> (i32, i32) {
    %c0_i32 = arith.constant 0 : i32
    return %arg0, %arg1 : i32, i32
  }
}

</mosaic_0001>

<bundles_post_ra>
// kernel: tpu_custom_call.1
= control target key start
LH: loop header
LB: loop body
LE: loop exit
PB: predicated region body
PF: predicated region fallthrough
CT: control target
= control target key end

     0   :  { %8 = vsyncpa [#allocation3], 0  ;;  %s705_s0 = inlined_call_operand.hbm [shape: f32[16,128], index: 0, kind: input, shape index: {}]   ;;  %s706_s1 = inlined_call_operand.hbm [shape: f32[128,128], index: 1, kind: input, shape index: {}]   ;;  %s707_s2 = inlined_call_operand.vmem [shape: f32[1,128], index: 2, kind: input, shape index: {}]   ;;  %s708_s3 = inlined_call_operand.hbm [shape: f32[16,128], index: 3, kind: output, shape index: {}]  }
   0x1   :  { %9 = vsyncpa [#allocation6], 0 }
   0x2   :  { %10 = vsyncpa [#allocation4], 0  ;;  %s564_s12 = smov [#allocation2]   ;;  %s492_s16 = scalar_lea.hbm %s705_s0, 256 }
   0x3   :  { %s16_s13 = sshll.u32 %s564_s12, 4  ;;  %p493_p0 = scmp.ne.s32.totalorder %s705_s0, %s492_s16  ;;  %s17_s13 = int_to_ptr.vmem [resolvable:$true] %s16_s13 }
   0x4   :  { %p496_p1 = scmp.lt.u32.totalorder %s492_s16, %s705_s0 }
   0x6   :  { %p498_p2 = pnand %p496_p1, %p493_p0 }
   0x8   :  { %501 = shalt.err (!%p498_p2)
}
   0x9   :  { %s502_s21 = scalar_lea.vmem %s17_s13, 256  ;;  %p507_p4 = scmp.lt.s32.totalorder %s17_s13, %s17_s13 }
   0xa   :  { %p503_p3 = scmp.ne.s32.totalorder %s17_s13, %s502_s21  ;;  %p508_p5 = scmp.lt.s32.totalorder %s502_s21, %s502_s21 }
   0xc   :  { %p509_p6 = por %p508_p5, %p507_p4 }
   0xe   :  { %p510_p7 = pnand %p509_p6, %p503_p3 }
  0x10   :  { %513 = shalt.err (!%p510_p7)
}
  0x11   :  { %s565_s22 = smov 128   ;;  %s566_s23 = smov 8  }
  0x12   :  { %22 = dma.hbm_to_vmem [thread:$0]  %s705_s0, 256, %s17_s13, [#allocation3], %s565_s22, %s565_s22, %s566_s23  }
  0x13   :  { %s567_s26 = smov [#allocation5]   ;;  %s514_s30 = scalar_lea.hbm %s706_s1, 2048 }
  0x14   :  { %s28_s27 = sshll.u32 %s567_s26, 4  ;;  %p515_p8 = scmp.ne.s32.totalorder %s706_s1, %s514_s30  ;;  %s29_s27 = int_to_ptr.vmem [resolvable:$true] %s28_s27 }
  0x15   :  { %p518_p9 = scmp.lt.u32.totalorder %s514_s30, %s706_s1 }
  0x17   :  { %p520_p10 = pnand %p518_p9, %p515_p8 }
  0x19   :  { %523 = shalt.err (!%p520_p10)
}
  0x1a   :  { %s524_s8 = scalar_lea.vmem %s29_s27, 2048  ;;  %p529_p12 = scmp.lt.s32.totalorder %s29_s27, %s29_s27 }
  0x1b   :  { %p525_p11 = scmp.ne.s32.totalorder %s29_s27, %s524_s8  ;;  %p530_p13 = scmp.lt.s32.totalorder %s524_s8, %s524_s8 }
  0x1d   :  { %p531_p0 = por %p530_p13, %p529_p12 }
  0x1f   :  { %p532_p1 = pnand %p531_p0, %p525_p11 }
  0x21   :  { %535 = shalt.err (!%p532_p1)
}
  0x22   :  { %34 = dma.hbm_to_vmem [thread:$0]  %s706_s1, 2048, %s29_s27, [#allocation6], %s565_s22, %s565_s22, %s566_s23  }
  0x23   :  { %558 = dma.done.wait [#allocation3], 256  }
  0x24   :  { %559 = vsyncadd [#allocation3], 4294967040 }
  0x25   :  { %560 = dma.done.wait [#allocation6], 2048  }
  0x26   :  { %561 = vsyncadd [#allocation6], 4294965248  ;;  %v45_v0 = vld [vmem:[#allocation5] sm:$0xff]  ;;  %v46_v1 = vld [vmem:[#allocation5 + $0x8] sm:$0xff]  ;;  %v568_v51 = vmov 683565275  }
  0x27   :  { %v47_v2 = vld [vmem:[#allocation5 + $0x10] sm:$0xff]  ;;  %v433_v3 = vpack.c.bf16 %v46_v1, %v45_v0  ;;  %v48_v4 = vld [vmem:[#allocation5 + $0x18] sm:$0xff]  ;;  %v49_v6 = vld [vmem:[#allocation5 + $0x20] sm:$0xff]  ;;  %v569_v55 = vmov 2475754826  }
  0x28   :  { %v437_v5 = vpack.c.bf16 %v48_v4, %v47_v2  ;;  %v50_v7 = vld [vmem:[#allocation5 + $0x28] sm:$0xff]  ;;  %v43_v9 = vld [vmem:[#allocation2] sm:$0xff]  ;;  %v52_v11 = vld [vmem:[#allocation5 + $0x38] sm:$0xff]  ;;  %v570_v57 = vmov 2131351028  }
  0x29   :  { %434 = vmatprep.subr.bf16.mxu0 %v433_v3  ;;  %v441_v8 = vpack.c.bf16 %v50_v7, %v49_v6  ;;  %v51_v10 = vld [vmem:[#allocation5 + $0x30] sm:$0xff]  ;;  %430 = vmatprep.mubr.f32.mxu0 %v43_v9  ;;  %v53_v13 = vld [vmem:[#allocation5 + $0x40] sm:$0xff]  ;;  %v54_v14 = vld [vmem:[#allocation5 + $0x48] sm:$0xff]  ;;  %v571_v59 = vmov 2102212464  }
  0x2a   :  { %436 = vmatpush3.bf16.msra.mxu0 %v433_v3  ;;  %v445_v12 = vpack.c.bf16 %v52_v11, %v51_v10  ;;  %v449_v15 = vpack.c.bf16 %v54_v14, %v53_v13  ;;  %v55_v16 = vld [vmem:[#allocation5 + $0x50] sm:$0xff]  ;;  %v56_v17 = vld [vmem:[#allocation5 + $0x58] sm:$0xff]  ;;  %v57_v19 = vld [vmem:[#allocation5 + $0x60] sm:$0xff]  ;;  %v572_v61 = vmov 920167782  }
  0x2b   :  { %438 = vmatprep.subr.bf16.mxu0 %v437_v5  ;;  %v453_v18 = vpack.c.bf16 %v56_v17, %v55_v16  ;;  %v58_v20 = vld [vmem:[#allocation5 + $0x68] sm:$0xff]  ;;  %v59_v22 = vld [vmem:[#allocation5 + $0x70] sm:$0xff]  ;;  %v60_v23 = vld [vmem:[#allocation5 + $0x78] sm:$0xff]  ;;  %v573_v4 = vmov 1326507024  }
  0x2c   :  { %v457_v21 = vpack.c.bf16 %v58_v20, %v57_v19  ;;  %v461_v24 = vpack.c.bf16 %v60_v23, %v59_v22  ;;  %v44_v25 = vld [vmem:[#allocation2 + $0x8] sm:$0xff]  ;;  %v371_v26 = vld [vmem:[%s707_s2] ss:$0 sm:$0xff]  ;;  %s574_s2 = smov [#allocation7]  }
  0x2d   :  { %s358_s11 = sshll.u32 %s574_s2, 4  ;;  %s359_s11 = int_to_ptr.vmem [resolvable:$true] %s358_s11 }
  0x2e   :  { %440 = vmatpush3.bf16.msra.mxu0 %v437_v5  ;;  %s536_s12 = scalar_lea.vmem %s359_s11, 256  ;;  %p541_p3 = scmp.lt.s32.totalorder %s359_s11, %s359_s11 }
  0x2f   :  { %442 = vmatprep.subr.bf16.mxu0 %v441_v8  ;;  %p537_p2 = scmp.ne.s32.totalorder %s359_s11, %s536_s12  ;;  %p542_p4 = scmp.lt.s32.totalorder %s536_s12, %s536_s12 }
  0x31   :  { %p543_p5 = por %p542_p4, %p541_p3 }
  0x32   :  { %444 = vmatpush3.bf16.msra.mxu0 %v441_v8 }
  0x33   :  { %446 = vmatprep.subr.bf16.mxu0 %v445_v12  ;;  %p544_p6 = pnand %p543_p5, %p537_p2 }
  0x36   :  { %448 = vmatpush3.bf16.msra.mxu0 %v445_v12 }
  0x37   :  { %450 = vmatprep.subr.bf16.mxu0 %v449_v15 }
  0x3a   :  { %452 = vmatpush3.bf16.msra.mxu0 %v449_v15 }
  0x3b   :  { %454 = vmatprep.subr.bf16.mxu0 %v453_v18 }
  0x3e   :  { %456 = vmatpush3.bf16.msra.mxu0 %v453_v18 }
  0x3f   :  { %458 = vmatprep.subr.bf16.mxu0 %v457_v21 }
  0x42   :  { %460 = vmatpush3.bf16.msra.mxu0 %v457_v21 }
  0x43   :  { %462 = vmatprep.subr.bf16.mxu0 %v461_v24 }
  0x46   :  { %464 = vmatpush3.bf16.msra.mxu0 %v461_v24 }
  0x49   :  { %431 = vmatmul.mubr.f32.vlgmr.msra.gmra.mrb[0].mxu0 %v44_v25 }
 0x11c   :  { %v432_v27 = vpop.f32.mrb[0].mxu0 }
 0x11d   :  { %v628_v28 = vadd.f32 %v432_v27, %v371_v26  ;;  %v134_v29 = vpop.f32.mrb[1].mxu0 }
 0x11e   :  { %v630_v30 = vadd.f32 %v371_v26, %v134_v29 }
 0x11f   :  { %v247_v31 = vand.u32 2147483647, %v628_v28  ;;  %v250_v32 = vand.u32 2139095040, %v628_v28  ;;  %vm249_vm14 = vcmp.lt.s32.totalorder %v628_v28, 0 }
 0x120   :  { %v146_v33 = vand.u32 2139095040, %v630_v30  ;;  %v143_v36 = vand.u32 2147483647, %v630_v30 }
 0x121   :  { %v251_v34 = vshrl.u32 %v250_v32, 23  ;;  %v254_v35 = vand.u32 8388607, %v247_v31  ;;  %vm248_vm15 = vcmp.le.f32.partialorder %v247_v31, 0.7853982 }
 0x122   :  { %v147_v37 = vshrl.u32 %v146_v33, 23  ;;  %v640_v42 = vand.u32 8388607, %v143_v36 }
 0x123   :  { %v376_v38 = vadd.s32 4294967169, %v251_v34  ;;  %v255_v41 = vor.u32 8388608, %v254_v35 }
 0x124   :  { %v372_v39 = vadd.s32 4294967169, %v147_v37  ;;  %v151_v49 = vor.u32 8388608, %v640_v42 }
 0x125   :  { %v257_v40 = vadd.s32 1, %v376_v38  ;;  %v642_v48 = vshll.u32 %v255_v41, 8 }
 0x126   :  { %v153_v43 = vadd.s32 1, %v372_v39 }
 0x127   :  { %vm258_vm0 = vcmp.gt.s32.totalorder %v257_v40, 0 }
 0x128   :  { %v259_v44 = vsel %vm258_vm0, %v257_v40, 0  ;;  %vm154_vm1 = vcmp.gt.s32.totalorder %v153_v43, 0  ;;  %vm145_vm0 = vcmp.lt.s32.totalorder %v630_v30, 0 }
 0x129   :  { %v260_v45 = vshrl.u32 %v259_v44, 5  ;;  %v261_v46 = vand.u32 31, %v259_v44  ;;  %v155_v47 = vsel %vm154_vm1, %v153_v43, 0  ;;  %v191_v43 = vshll.u32 %v151_v49, 8 }
 0x12a   :  { %v645_v53 = vshrl.u32 %v155_v47, 5  ;;  %v157_v54 = vand.u32 31, %v155_v47  ;;  %vm144_vm1 = vcmp.le.f32.partialorder %v143_v36, 0.7853982 }
 0x12b   :  { %v262_v50 = vsub.s32 32, %v261_v46  ;;  %v264_v52 = vshll.u32 %v568_v51, %v261_v46  ;;  %v267_v56 = vshll.u32 %v569_v55, %v261_v46  ;;  %v270_v58 = vshll.u32 %v570_v57, %v261_v46 }
 0x12c   :  { %v273_v60 = vshll.u32 %v571_v59, %v261_v46  ;;  %v276_v62 = vshll.u32 %v572_v61, %v261_v46  ;;  %vm279_vm2 = vcmp.lt.s32.totalorder %v260_v45, 1  ;;  %vm280_vm3 = vcmp.lt.s32.totalorder %v260_v45, 2 }
 0x12d   :  { %v265_v63 = vshrl.u32 %v569_v55, %v262_v50  ;;  %v268_v0 = vshrl.u32 %v570_v57, %v262_v50  ;;  %v271_v1 = vshrl.u32 %v571_v59, %v262_v50  ;;  %v263_v2 = vshrl.u32 %v568_v51, %v262_v50 }
 0x12e   :  { %v274_v3 = vshrl.u32 %v572_v61, %v262_v50  ;;  %v277_v5 = vshrl.u32 %v573_v4, %v262_v50  ;;  %v158_v9 = vsub.s32 32, %v157_v54  ;;  %vm281_vm4 = vcmp.lt.s32.totalorder %v260_v45, 3 }
 0x12f   :  { %v266_v6 = vor.u32 %v265_v63, %v264_v52  ;;  %v269_v7 = vor.u32 %v268_v0, %v267_v56  ;;  %v272_v8 = vor.u32 %v271_v1, %v270_v58  ;;  %vm282_vm5 = vcmp.lt.s32.totalorder %v260_v45, 4 }
 0x130   :  { %v275_v10 = vor.u32 %v274_v3, %v273_v60  ;;  %v278_v11 = vor.u32 %v277_v5, %v276_v62  ;;  %v160_v19 = vshll.u32 %v568_v51, %v157_v54  ;;  %v161_v22 = vshrl.u32 %v569_v55, %v158_v9 }
 0x131   :  { %v283_v12 = vsel %vm279_vm2, %v263_v2, %v266_v6  ;;  %v284_v13 = vsel %vm282_vm5, %v272_v8, 2102212464  ;;  %v287_v14 = vsel %vm279_vm2, %v266_v6, %v269_v7  ;;  %v291_v15 = vsel %vm279_vm2, %v269_v7, %v272_v8 }
 0x132   :  { %v285_v16 = vsel %vm281_vm4, %v269_v7, %v284_v13  ;;  %v288_v17 = vsel %vm282_vm5, %v275_v10, 920167782  ;;  %v292_v18 = vsel %vm282_vm5, %v278_v11, 1326507024  ;;  %v163_v23 = vshll.u32 %v569_v55, %v157_v54 }
 0x133   :  { %v289_v20 = vsel %vm281_vm4, %v272_v8, %v288_v17  ;;  %v293_v21 = vsel %vm281_vm4, %v275_v10, %v292_v18  ;;  %v286_v24 = vsel %vm280_vm3, %v283_v12, %v285_v16  ;;  %v164_v27 = vshrl.u32 %v570_v57, %v158_v9 }
 0x134   :  { %v290_v25 = vsel %vm280_vm3, %v287_v14, %v289_v20  ;;  %v294_v26 = vsel %vm280_vm3, %v291_v15, %v293_v21  ;;  %v162_v35 = vor.u32 %v161_v22, %v160_v19  ;;  %v166_v38 = vshll.u32 %v570_v57, %v157_v54 }
 0x135   :  { %v654_v29 = vmul.u32.u64.low %v642_v48, %v294_v26  ;;  %v655_v32 = vmul.u32.u64.high %v642_v48, %v294_v26, %v654_v29  ;;  %v658_v33 = vmul.u32.u64.low %v642_v48, %v290_v25  ;;  %v659_v34 = vmul.u32.u64.high %v642_v48, %v290_v25, %v658_v33 }
 0x136   :  { %v165_v37 = vor.u32 %v164_v27, %v163_v23  ;;  %v167_v39 = vshrl.u32 %v571_v59, %v158_v9  ;;  %v169_v40 = vshll.u32 %v571_v59, %v157_v54  ;;  %v170_v41 = vshrl.u32 %v572_v61, %v158_v9 }
 0x137   :  { %v173_v42 = vshrl.u32 %v573_v4, %v158_v9  ;;  %v302_v44 = vmul.u32 %v642_v48, %v286_v24  ;;  %v159_v45 = vshrl.u32 %v568_v51, %v158_v9  ;;  %v172_v47 = vshll.u32 %v572_v61, %v157_v54 }
 0x138   :  { %v168_v46 = vor.u32 %v167_v39, %v166_v38  ;;  %vm304_vm6 = vc.u32 %v655_v32, %v658_v33  ;;  %v305_v50 = vadd.s32 1, %v659_v34  ;;  %v171_v52 = vor.u32 %v170_v41, %v169_v40 }
 0x139   :  { %vm175_vm7 = vcmp.lt.s32.totalorder %v645_v53, 1  ;;  %v174_v55 = vor.u32 %v173_v42, %v172_v47  ;;  %vm177_vm8 = vcmp.lt.s32.totalorder %v645_v53, 3  ;;  %vm178_vm9 = vcmp.lt.s32.totalorder %v645_v53, 4 }
 0x13a   :  { %v183_v56 = vsel %vm175_vm7, %v162_v35, %v165_v37  ;;  %v306_v49 = vsel %vm304_vm6, %v305_v50, %v659_v34  ;;  %v180_v57 = vsel %vm178_vm9, %v168_v46, 2102212464  ;;  %v184_v48 = vsel %vm178_vm9, %v171_v52, 920167782 }
 0x13b   :  { %v187_v51 = vsel %vm175_vm7, %v165_v37, %v168_v46  ;;  %v307_v58 = vadd.s32 %v306_v49, %v302_v44  ;;  %vm176_vm10 = vcmp.lt.s32.totalorder %v645_v53, 2  ;;  %v185_v54 = vsel %vm177_vm8, %v168_v46, %v184_v48 }
 0x13c   :  { %v188_v59 = vsel %vm178_vm9, %v174_v55, 1326507024  ;;  %v179_v60 = vsel %vm175_vm7, %v159_v45, %v162_v35  ;;  %v181_v61 = vsel %vm177_vm8, %v165_v37, %v180_v57  ;;  %v186_v62 = vsel %vm176_vm10, %v183_v56, %v185_v54 }
 0x13d   :  { %v189_v63 = vsel %vm177_vm8, %v171_v52, %v188_v59  ;;  %v308_v0 = vadd.s32 536870912, %v307_v58  ;;  %v669_v2 = vmul.u32.u64.low %v191_v43, %v186_v62  ;;  %v670_v3 = vmul.u32.u64.high %v191_v43, %v186_v62, %v669_v2 }
 0x13e   :  { %v190_v1 = vsel %vm176_vm10, %v187_v51, %v189_v63  ;;  %v182_v7 = vsel %vm176_vm10, %v179_v60, %v181_v61  ;;  %v303_v23 = vadd.s32 %v658_v33, %v655_v32  ;;  %vm339_vm5 = vweird.f32 %v628_v28 }
 0x13f   :  { %v672_v4 = vmul.u32.u64.low %v191_v43, %v190_v1  ;;  %v673_v5 = vmul.u32.u64.high %v191_v43, %v190_v1, %v672_v4  ;;  %v309_v6 = vshrl.u32 %v308_v0, 30  ;;  %v201_v9 = vadd.s32 1, %v670_v3 }
 0x140   :  { %v198_v53 = vmul.u32 %v191_v43, %v182_v7  ;;  %vm235_vm9 = vweird.f32 %v630_v30 }
 0x141   :  { %v310_v8 = vshll.u32 %v309_v6, 30  ;;  %vm200_vm11 = vc.u32 %v673_v5, %v669_v2  ;;  %v199_v44 = vadd.s32 %v669_v2, %v673_v5  ;;  %v333_v33 = vsub.s32 4, %v309_v6 }
 0x142   :  { %v202_v11 = vsel %vm200_vm11, %v201_v9, %v670_v3 }
 0x143   :  { %v311_v10 = vsub.s32 %v307_v58, %v310_v8  ;;  %v203_v12 = vadd.s32 %v202_v11, %v198_v53  ;;  %v334_v48 = vsel %vm249_vm14, %v333_v33, %v309_v6 }
 0x144   :  { %v336_v60 = vsel %vm248_vm15, 0, %v334_v48 }
 0x145   :  { %v313_v13 = vsub.s32 0, %v311_v10  ;;  %v204_v14 = vadd.s32 536870912, %v203_v12  ;;  %v340_v63 = vadd.s32 3, %v336_v60 }
 0x147   :  { %v377_v15 = vmin.u32 %v313_v13, %v311_v10  ;;  %v205_v16 = vshrl.u32 %v204_v14, 30  ;;  %v341_v3 = vand.u32 3, %v340_v63 }
 0x149   :  { %v315_v17 = vclz %v377_v15  ;;  %v206_v18 = vshll.u32 %v205_v16, 30  ;;  %v229_v62 = vsub.s32 4, %v205_v16  ;;  %vm346_vm2 = vcmp.eq.s32.totalorder %v341_v3, 2 }
 0x14a   :  { %vm343_vm3 = vcmp.eq.s32.totalorder %v341_v3, 0  ;;  %vm342_vm4 = vcmp.lt.s32.totalorder %v341_v3, 2 }
 0x14b   :  { %v378_v19 = vadd.s32 4294967294, %v315_v17  ;;  %v207_v20 = vsub.s32 %v203_v12, %v206_v18  ;;  %v230_v1 = vsel %vm145_vm0, %v229_v62, %v205_v16 }
 0x14c   :  { %v232_v5 = vsel %vm144_vm1, 0, %v230_v1 }
 0x14d   :  { %vm379_vm12 = vcmp.lt.s32.totalorder %v378_v19, 0  ;;  %v209_v22 = vsub.s32 0, %v207_v20  ;;  %v236_v9 = vadd.s32 3, %v232_v5 }
 0x14e   :  { %v318_v21 = vsel %vm379_vm12, 0, %v378_v19 }
 0x14f   :  { %v319_v24 = vsub.s32 32, %v318_v21  ;;  %v323_v25 = vsub.s32 4294967266, %v318_v21  ;;  %v373_v26 = vmin.u32 %v209_v22, %v207_v20  ;;  %v320_v27 = vshll.u32 %v311_v10, %v318_v21 }
 0x150   :  { %v237_v12 = vand.u32 3, %v236_v9 }
 0x151   :  { %v321_v29 = vshrl.u32 %v303_v23, %v319_v24  ;;  %v324_v34 = vadd.s32 127, %v323_v25  ;;  %v211_v35 = vclz %v373_v26 }
 0x152   :  { %vm242_vm6 = vcmp.eq.s32.totalorder %v237_v12, 2  ;;  %vm239_vm7 = vcmp.eq.s32.totalorder %v237_v12, 0  ;;  %vm238_vm8 = vcmp.lt.s32.totalorder %v237_v12, 2 }
 0x153   :  { %v322_v37 = vor.u32 %v321_v29, %v320_v27  ;;  %v325_v38 = vshll.u32 %v324_v34, 23  ;;  %v374_v39 = vadd.s32 4294967294, %v211_v35 }
 0x155   :  { %v326_v40 = vor.u32 4788187, %v325_v38  ;;  %vm375_vm13 = vcmp.lt.s32.totalorder %v374_v39, 0  ;;  %v329_v42 = vcvt.s32.f32 %v322_v37 }
 0x156   :  { %v214_v43 = vsel %vm375_vm13, 0, %v374_v39 }
 0x157   :  { %v327_v41 = vand.u32 2147483647, %v326_v40  ;;  %v215_v45 = vsub.s32 32, %v214_v43  ;;  %v219_v46 = vsub.s32 4294967266, %v214_v43  ;;  %v216_v47 = vshll.u32 %v207_v20, %v214_v43 }
 0x159   :  { %v330_v32 = vmul.f32 %v329_v42, %v327_v41  ;;  %v217_v50 = vshrl.u32 %v199_v44, %v215_v45  ;;  %v220_v52 = vadd.s32 127, %v219_v46 }
 0x15b   :  { %v331_v55 = vxor.u32 2147483648, %v330_v32  ;;  %v218_v56 = vor.u32 %v217_v50, %v216_v47  ;;  %v221_v49 = vshll.u32 %v220_v52, 23 }
 0x15d   :  { %v332_v57 = vsel %vm249_vm14, %v331_v55, %v330_v32  ;;  %v222_v58 = vor.u32 4788187, %v221_v49  ;;  %v225_v59 = vcvt.s32.f32 %v218_v56 }
 0x15e   :  { %v335_v51 = vsel %vm248_vm15, %v628_v28, %v332_v57 }
 0x15f   :  { %484 = vcosq.f32 %v335_v51  ;;  %v223_v54 = vand.u32 2147483647, %v222_v58 }
 0x160   :  { %486 = vsinq.f32 %v335_v51 }
 0x161   :  { %v226_v61 = vmul.f32 %v225_v59, %v223_v54 }
 0x163   :  { %v227_v0 = vxor.u32 2147483648, %v226_v61 }
 0x165   :  { %v228_v31 = vsel %vm145_vm0, %v227_v0, %v226_v61 }
 0x166   :  { %v231_v2 = vsel %vm144_vm1, %v630_v30, %v228_v31 }
 0x167   :  { %488 = vcosq.f32 %v231_v2 }
 0x168   :  { %490 = vsinq.f32 %v231_v2 }
 0x169   :  { %v485_v4 = vpop.eup %484 }
 0x16a   :  { %v487_v6 = vpop.eup %486  ;;  %v347_v7 = vxor.u32 2147483648, %v485_v4 }
 0x16b   :  { %v344_v8 = vxor.u32 2147483648, %v487_v6 }
 0x16c   :  { %v348_v53 = vsel %vm346_vm2, %v347_v7, %v487_v6 }
 0x16d   :  { %v345_v10 = vsel %vm343_vm3, %v485_v4, %v344_v8 }
 0x16e   :  { %v349_v36 = vsel %vm342_vm4, %v345_v10, %v348_v53 }
 0x16f   :  { %v350_v11 = vsel %vm339_vm5, nan, %v349_v36 }
 0x170   :  { %352 = vst [vmem:[#allocation7 + $0x8] sm:$0xff] %v350_v11 }
 0x171   :  { %v489_v13 = vpop.eup %488 }
 0x172   :  { %v491_v14 = vpop.eup %490  ;;  %v243_v15 = vxor.u32 2147483648, %v489_v13 }
 0x173   :  { %v240_v16 = vxor.u32 2147483648, %v491_v14 }
 0x174   :  { %v244_v17 = vsel %vm242_vm6, %v243_v15, %v491_v14 }
 0x175   :  { %v241_v18 = vsel %vm239_vm7, %v489_v13, %v240_v16 }
 0x176   :  { %v245_v19 = vsel %vm238_vm8, %v241_v18, %v244_v17 }
 0x177   :  { %v246_v28 = vsel %vm235_vm9, nan, %v245_v19 }
 0x178   :  { %351 = vst [vmem:[#allocation7] sm:$0xff] %v246_v28 }
 0x179   :  { %547 = shalt.err (!%p544_p6)
}
 0x17a   :  { %s548_s15 = scalar_lea.hbm %s708_s3, 256 }
 0x17b   :  { %p549_p7 = scmp.ne.s32.totalorder %s708_s3, %s548_s15  ;;  %p552_p8 = scmp.lt.u32.totalorder %s548_s15, %s708_s3 }
 0x17d   :  { %p554_p9 = pnand %p552_p8, %p549_p7 }
 0x17f   :  { %557 = shalt.err (!%p554_p9)
}
 0x180   :  { %364 = dma.vmem_to_hbm [thread:$0]  %s359_s11, 256, %s708_s3, [#allocation4], %s565_s22, %s565_s22, %s566_s23  }
 0x181   :  { %562 = dma.done.wait [#allocation4], 256  }
 0x182   :  { %563 = vsyncadd [#allocation4], 4294967040 }
 0x183   :  { %368 = vsyncpa [#allocation3], 1 }
 0x184   :  { %369 = vsyncpa [#allocation6], 1 }
 0x185   :  { %370 = vsyncpa [#allocation4], 1 }

</bundles_post_ra>
